<compile_context>
chip_gen: v7x
topology: tpu7x:2x2x1
jax: 0.10.0
libtpu: 0.0.40
codegen_flags: <defaults>
</compile_context>

<pallas_src>
import functools

import jax
import jax.numpy as jnp
from jax.experimental import pallas as pl
from jax.experimental.pallas import tpu as pltpu


def _round_up(x, m):
    return ((x + m - 1) // m) * m


def _gem_kernel(p_ref, x_ref, o_ref, mn_ref, *, eps):
    """Processes one (TR, TN) tile of the flattened [R, N] input.

    p_ref  : SMEM (1,)     learned power p
    x_ref  : VMEM (TR, TN) input tile (reduced over the lane axis)
    o_ref  : VMEM (TR, 1)  output block; doubles as the running-max accumulator
    mn_ref : VMEM (TR, 1)  scratch running-min accumulator (used when p <= 0)
    """
    k = pl.program_id(1)
    x = x_ref[...]                                   # reduce in input dtype (bf16 ok: max/min are exact)
    pmax = jnp.max(x, axis=-1, keepdims=True)
    pmin = jnp.min(x, axis=-1, keepdims=True)

    @pl.when(k == 0)
    def _init():
        o_ref[...] = pmax.astype(o_ref.dtype)
        mn_ref[...] = pmin.astype(jnp.float32)

    @pl.when(k > 0)
    def _accum():
        o_ref[...] = jnp.maximum(o_ref[...], pmax.astype(o_ref.dtype))
        mn_ref[...] = jnp.minimum(mn_ref[...], pmin.astype(jnp.float32))

    @pl.when(k == pl.num_programs(1) - 1)
    def _finalize():
        p = p_ref[0]
        # clamp commutes with max/min: max(clamp(x,eps)) == maximum(max_N(x), eps)
        mx = jnp.maximum(o_ref[...].astype(jnp.float32), eps)
        mn = jnp.maximum(mn_ref[...], eps)
        # pow cancels around the reduce (see header); only a select on the
        # already-reduced (TR, 1) vector remains.
        r = jnp.where(p > 0, mx, jnp.where(p < 0, mn, jnp.ones_like(mx)))
        o_ref[...] = r.astype(o_ref.dtype)


def gem_forward(x, p, eps: float = 1e-6, *, block_rows: int = 512, block_n: int = 1024):
    """GeM (max variant). x: [B, C, N], p: [1]  ->  [B, C]."""
    B, C, N = x.shape
    R = B * C
    xf = x.reshape(R, N)

    # Row tiling (sublane axis): multiple of 8; padded junk rows are sliced off.
    tr = block_rows if R >= block_rows else _round_up(R, 8)
    r_pad = _round_up(R, tr)
    if r_pad != R:
        xf = jnp.pad(xf, ((0, r_pad - R), (0, 0)))   # zero pad; dropped after the call

    # N tiling (lane axis): largest multiple of 128 that divides N, capped at
    # block_n; otherwise fall back to the full (un-tiled) last dim (allowed:
    # block equals the full array extent).
    tn = N
    if N % 128 == 0:
        t = min(block_n, N)
        while t >= 128 and N % t != 0:
            t -= 128
        if t >= 128:
            tn = t

    grid = (r_pad // tr, N // tn)   # reduction axis last

    out = pl.pallas_call(
        functools.partial(_gem_kernel, eps=float(eps)),
        out_shape=jax.ShapeDtypeStruct((r_pad, 1), x.dtype),
        grid=grid,
        in_specs=[
            pl.BlockSpec(memory_space=pltpu.SMEM),            # p (scalar, whole array in SMEM)
            pl.BlockSpec((tr, tn), lambda i, k: (i, k)),      # x tile
        ],
        out_specs=pl.BlockSpec((tr, 1), lambda i, k: (i, 0)), # resident across k (accumulator)
        scratch_shapes=[pltpu.VMEM((tr, 1), jnp.float32)],    # running min
        compiler_params=pltpu.CompilerParams(
            dimension_semantics=("parallel", "arbitrary"),
        ),
    )(p, xf)

    return out[:R, 0].reshape(B, C)


def gem_reference(x, p, eps: float = 1e-6):
    xc = jnp.maximum(x, eps) ** p[0]
    m = jnp.max(xc, axis=-1)
    return m ** (1.0 / p[0])


if __name__ == "__main__":
    key = jax.random.PRNGKey(0)

    # --- Case 1: standard GeM default power (cfg.p = 3.0); small blocks to
    # exercise both the row-parallel axis and the N-reduction accumulator path.
    B, C, N = 2, 32, 256
    x = jax.random.normal(key, (B, C, N), dtype=jnp.float32)
    eps = 1e-6
    p = jnp.ones((1,), dtype=jnp.float32) * 3.0
    out = jax.block_until_ready(gem_forward(x, p, eps, block_rows=32, block_n=128))
    ref = gem_reference(x, p, eps)
    assert out.shape == (B, C)
    assert jnp.allclose(out, ref, rtol=1e-5, atol=1e-5), (
        f"max abs err = {jnp.max(jnp.abs(out - ref))}"
    )

    # --- Case 2: negative p exercises the min path (positive data so min != eps).
    x2 = jnp.abs(x) + 0.5
    p2 = jnp.ones((1,), dtype=jnp.float32) * -2.0
    out2 = jax.block_until_ready(gem_forward(x2, p2, eps, block_rows=32, block_n=128))
    ref2 = gem_reference(x2, p2, eps)
    assert jnp.allclose(out2, ref2, rtol=1e-5, atol=1e-5), (
        f"max abs err (p<0) = {jnp.max(jnp.abs(out2 - ref2))}"
    )

    # --- Case 3: N not a multiple of 128 -> full-extent (un-tiled) lane block.
    B3, C3, N3 = 2, 4, 96
    x3 = jax.random.normal(jax.random.PRNGKey(1), (B3, C3, N3), dtype=jnp.float32)
    out3 = jax.block_until_ready(gem_forward(x3, p, eps))
    ref3 = gem_reference(x3, p, eps)
    assert out3.shape == (B3, C3)
    assert jnp.allclose(out3, ref3, rtol=1e-5, atol=1e-5), (
        f"max abs err (ragged N) = {jnp.max(jnp.abs(out3 - ref3))}"
    )

    print("KERNEL_OK")
</pallas_src>

<mosaic_0001>
module attributes {stable_mosaic.version = 11 : i64} {
  func.func @_gem_kernel(%arg0: i32, %arg1: i32, %arg2: memref<1xf32, #tpu.memory_space<smem>>, %arg3: memref<32x128xf32, #tpu.memory_space<vmem>>, %arg4: memref<32x1xf32, #tpu.memory_space<vmem>>, %arg5: memref<32x1xf32, #tpu.memory_space<vmem>>) attributes {dimension_semantics = [#tpu.dimension_semantics<parallel>, #tpu.dimension_semantics<arbitrary>], iteration_bounds = array<i64: 2, 2>, scalar_prefetch = 0 : i64, scratch_operands = 1 : i64, tpu.core_type = #tpu.core_type<tc>, window_params = [{transform_indices = @transform_0, window_bounds = array<i64: 1>}, {transform_indices = @transform_1, window_bounds = array<i64: 32, 128>}, {transform_indices = @transform_2, window_bounds = array<i64: 32, 1>}]} {
    %c0 = arith.constant 0 : index
    %c0_0 = arith.constant 0 : index
    %0 = vector.load %arg3[%c0, %c0_0] : memref<32x128xf32, #tpu.memory_space<vmem>>, vector<32x128xf32>
    %cst = arith.constant dense<0xFF800000> : vector<32xf32>
    %1 = vector.multi_reduction <maximumf>, %0, %cst [1] : vector<32x128xf32> to vector<32xf32>
    %2 = vector.shape_cast %1 : vector<32xf32> to vector<32x1xf32>
    %cst_1 = arith.constant dense<0x7F800000> : vector<32xf32>
    %3 = vector.multi_reduction <minimumf>, %0, %cst_1 [1] : vector<32x128xf32> to vector<32xf32>
    %4 = vector.shape_cast %3 : vector<32xf32> to vector<32x1xf32>
    %c0_i32 = arith.constant 0 : i32
    %5 = arith.cmpi eq, %arg1, %c0_i32 : i32
    %6 = arith.extui %5 : i1 to i32
    %c0_i32_2 = arith.constant 0 : i32
    %7 = arith.cmpi ne, %6, %c0_i32_2 : i32
    scf.if %7 {
      %c0_6 = arith.constant 0 : index
      %c0_7 = arith.constant 0 : index
      %14 = vector.load %arg4[%c0_6, %c0_7] : memref<32x1xf32, #tpu.memory_space<vmem>>, vector<32x1xf32>
      tpu.vector_store %arg4[%c0_6, %c0_7], %2 {strides = array<i32>} : memref<32x1xf32, #tpu.memory_space<vmem>>, vector<32x1xf32>,
      %c0_8 = arith.constant 0 : index
      %c0_9 = arith.constant 0 : index
      %15 = vector.load %arg5[%c0_8, %c0_9] : memref<32x1xf32, #tpu.memory_space<vmem>>, vector<32x1xf32>
      tpu.vector_store %arg5[%c0_8, %c0_9], %4 {strides = array<i32>} : memref<32x1xf32, #tpu.memory_space<vmem>>, vector<32x1xf32>,
    } else {
    }
    %c0_i32_3 = arith.constant 0 : i32
    %8 = arith.cmpi sgt, %arg1, %c0_i32_3 : i32
    %9 = arith.extui %8 : i1 to i32
    %c0_i32_4 = arith.constant 0 : i32
    %10 = arith.cmpi ne, %9, %c0_i32_4 : i32
    scf.if %10 {
      %c0_6 = arith.constant 0 : index
      %c0_7 = arith.constant 0 : index
      %14 = vector.load %arg4[%c0_6, %c0_7] : memref<32x1xf32, #tpu.memory_space<vmem>>, vector<32x1xf32>
      %15 = arith.maximumf %14, %2 : vector<32x1xf32>
      %c0_8 = arith.constant 0 : index
      %c0_9 = arith.constant 0 : index
      %16 = vector.load %arg4[%c0_8, %c0_9] : memref<32x1xf32, #tpu.memory_space<vmem>>, vector<32x1xf32>
      tpu.vector_store %arg4[%c0_8, %c0_9], %15 {strides = array<i32>} : memref<32x1xf32, #tpu.memory_space<vmem>>, vector<32x1xf32>,
      %c0_10 = arith.constant 0 : index
      %c0_11 = arith.constant 0 : index
      %17 = vector.load %arg5[%c0_10, %c0_11] : memref<32x1xf32, #tpu.memory_space<vmem>>, vector<32x1xf32>
      %18 = arith.minimumf %17, %4 : vector<32x1xf32>
      %c0_12 = arith.constant 0 : index
      %c0_13 = arith.constant 0 : index
      %19 = vector.load %arg5[%c0_12, %c0_13] : memref<32x1xf32, #tpu.memory_space<vmem>>, vector<32x1xf32>
      tpu.vector_store %arg5[%c0_12, %c0_13], %18 {strides = array<i32>} : memref<32x1xf32, #tpu.memory_space<vmem>>, vector<32x1xf32>,
    } else {
    }
    %c1_i32 = arith.constant 1 : i32
    %11 = arith.cmpi eq, %arg1, %c1_i32 : i32
    %12 = arith.extui %11 : i1 to i32
    %c0_i32_5 = arith.constant 0 : i32
    %13 = arith.cmpi ne, %12, %c0_i32_5 : i32
    scf.if %13 {
      %c0_6 = arith.constant 0 : index
      %14 = memref.load %arg2[%c0_6] : memref<1xf32, #tpu.memory_space<smem>>
      %c0_7 = arith.constant 0 : index
      %c0_8 = arith.constant 0 : index
      %15 = vector.load %arg4[%c0_7, %c0_8] : memref<32x1xf32, #tpu.memory_space<vmem>>, vector<32x1xf32>
      %cst_9 = arith.constant 9.99999997E-7 : f32
      %16 = vector.broadcast %cst_9 : f32 to vector<32x1xf32>
      %17 = arith.maximumf %15, %16 : vector<32x1xf32>
      %c0_10 = arith.constant 0 : index
      %c0_11 = arith.constant 0 : index
      %18 = vector.load %arg5[%c0_10, %c0_11] : memref<32x1xf32, #tpu.memory_space<vmem>>, vector<32x1xf32>
      %cst_12 = arith.constant 9.99999997E-7 : f32
      %19 = vector.broadcast %cst_12 : f32 to vector<32x1xf32>
      %20 = arith.maximumf %18, %19 : vector<32x1xf32>
      %cst_13 = arith.constant 0.000000e+00 : f32
      %21 = arith.cmpf ogt, %14, %cst_13 : f32
      %cst_14 = arith.constant 0.000000e+00 : f32
      %22 = arith.cmpf olt, %14, %cst_14 : f32
      %cst_15 = arith.constant 1.000000e+00 : f32
      %23 = vector.broadcast %cst_15 : f32 to vector<32x1xf32>
      %24 = arith.select %22, %20, %23 : vector<32x1xf32>
      %25 = arith.select %21, %17, %24 : vector<32x1xf32>
      %c0_16 = arith.constant 0 : index
      %c0_17 = arith.constant 0 : index
      %26 = vector.load %arg4[%c0_16, %c0_17] : memref<32x1xf32, #tpu.memory_space<vmem>>, vector<32x1xf32>
      tpu.vector_store %arg4[%c0_16, %c0_17], %25 {strides = array<i32>} : memref<32x1xf32, #tpu.memory_space<vmem>>, vector<32x1xf32>,
    } else {
    }
    return
  }
  func.func @transform_0(%arg0: i32, %arg1: i32) -> i32 {
    %c0_i32 = arith.constant 0 : i32
    %c0_i32_0 = arith.constant 0 : i32
    return %c0_i32 : i32
  }
  func.func @transform_1(%arg0: i32, %arg1: i32) -> (i32, i32) {
    %c0_i32 = arith.constant 0 : i32
    return %arg0, %arg1 : i32, i32
  }
  func.func @transform_2(%arg0: i32, %arg1: i32) -> (i32, i32) {
    %c0_i32 = arith.constant 0 : i32
    %c0_i32_0 = arith.constant 0 : i32
    return %arg0, %c0_i32 : i32, i32
  }
}

</mosaic_0001>

<bundles_post_ra>
// kernel: tpu_custom_call.1
= control target key start
LH: loop header
LB: loop body
LE: loop exit
PB: predicated region body
PF: predicated region fallthrough
CT: control target
= control target key end

     0   :  { %s763_s0 = inlined_call_operand.<no memory space> [shape: f32[1], index: 0, kind: input, shape index: {}]   ;;  %s764_s1 = inlined_call_operand.hbm [shape: f32[64,256], index: 1, kind: input, shape index: {}]   ;;  %s765_s2 = inlined_call_operand.vmem [shape: f32[64,1], index: 2, kind: output, shape index: {}]  }
   0x1   :  { %7 = sst [smem:[#allocation3]] %s763_s0 }
   0x2   :  { %8 = vsyncpa [#allocation5], 0 }
   0x3   :  { %10 = vsyncpa [#allocation5 + $0x1], 0  ;;  %s580_s11 = smov 0   ;;  %s582_s12 = smov 0  }
   0x4   :  { %s584_s13 = smov 0   ;;  %s586_s14 = smov 0  }
   0x5   :  { %s588_s15 = smov 0   ;;  %s590_s16 = smov 0  }
   0x6   :  { %s592_s17 = smov 0   ;;  %s594_s18 = smov 0  }
   0x7 LB: > { %s368_s0 = sadd.s32 4294967295, %s556_s18   ;;  %s25_s19 = sadd.s32 1, %s548_s16  ;;  %s556_s18 = sphi %s594_s18, %s16_s18   ;;  %s552_s17 = sphi %s592_s17, %s776_s17   ;;  %s548_s16 = sphi %s590_s16, %s775_s16   ;;  %s544_s15 = sphi %s588_s15, %s774_s15   ;;  %s540_s14 = sphi %s586_s14, %s773_s14   ;;  %s536_s13 = sphi %s584_s13, %s772_s13   ;;  %s532_s12 = sphi %s582_s12, %s771_s12   ;;  %s528_s11 = sphi %s580_s11, %s770_s11  }
   0x8   : > { %p26_p0 = scmp.ge.s32.totalorder %s25_s19, 2  ;;  %s28_s20 = sadd.s32 1, %s552_s17 }
   0x9   : > { %s58_s21 = sadd.s32 1, %s536_s13  ;;  %p65_p1 = scmp.ne.s32.totalorder %s536_s13, %s532_s12 }
   0xa   : > { %s778_s19 = smov (%p26_p0, %s25_s19), 0  ;;  %s780_s20 = smov (!%p26_p0, %s28_s20), %s552_s17 }
   0xb   : > { %s54_s22 = ssub.s32 %s548_s16, %s778_s19  ;;  %p66_p2 = scmp.eq.s32.totalorder %s556_s18, 0 }
   0xc   : > { %p30_p3 = scmp.ge.s32.totalorder %s780_s20, 2  ;;  %p71_p4 = scmp.ne.s32.totalorder %s532_s12, %s528_s11 }
   0xd   : > { %p631_p5 = por %p66_p2, %p65_p1  ;;  %p72_p6 = scmp.eq.s32.totalorder %s368_s0, 0 }
   0xe   : > { %s782_s20 = smov (%p30_p3, %s780_s20), 0  ;;  %p392_p8 = scmp.lt.s32.totalorder %s556_s18, 4 }
   0xf   : > { %p637_p7 = por %p72_p6, %p71_p4  ;;  %s53_s25 = ssub.s32 %s552_s17, %s782_s20 }
  0x10   : > { %s55_s26 = sor.u32 %s54_s22, %s53_s25  ;;  %s124_s27 = sand.u32 1, %s536_s13  }
  0x11   : > { %p56_p9 = scmp.eq.s32.totalorder %s55_s26, 0  ;;  %s372_s28 = sshll.u32 %s124_s27, 5 }
  0x12   : > { %s385_s29 = sshll.u32 %s552_s17, 3  ;;  %s128_s5 = scalar_lea.vmem [#allocation4], %s372_s28 }
  0x13   : > { %s647_s30 = scalar_select %p56_p9, %s536_s13, %s58_s21  }
  0x14   : > { %s134_s3 = sadd.s32 %s548_s16, %s385_s29  ;;  %s137_s6 = sshll.u32 %s128_s5, 4  ;;  %s655_s6 = int_to_ptr.vmem [resolvable:$true] %s137_s6 }
  0x15   : > { %s375_s4 = sshll.u32 %s134_s3, 7  ;;  %p661_p10 = pnand %p392_p8, %p631_p5 }
  0x16   : > { %s653_s9 = scalar_lea.hbm %s764_s1, %s375_s4  ;;  %s666_s11 = scalar_lea.sflag [#allocation5], %s124_s27 }
  0x17   : > { %s460_s0 = scalar_lea.hbm %s653_s9, 512  ;;  %p462_p13 = pneg %p661_p10 }
  0x18   : > { %p461_p12 = scmp.ne.s32.totalorder %s653_s9, %s460_s0  ;;  %s465_s23 = scalar_lea.hbm %s764_s1, 2048 }
  0x19   : > { %p466_p2 = scmp.lt.u32.totalorder %s653_s9, %s764_s1  ;;  %p467_p3 = scmp.lt.u32.totalorder %s465_s23, %s460_s0 }
  0x1a   : > { %p463_p0 = pnand %p462_p13, %p461_p12  ;;  %p469_p5 = scmp.lt.u32.totalorder %s460_s0, %s653_s9 }
  0x1b   : > { %p468_p4 = por %p467_p3, %p466_p2 }
  0x1c   : > { %p464_p1 = pneg %p463_p0 }
  0x1d   : > { %p470_p6 = por %p469_p5, %p468_p4 }
  0x1f   : > { %p471_p8 = pnand %p470_p6, %p464_p1 }
  0x21   : > { %474 = shalt.err (!%p471_p8)
}
  0x22   : > { %s475_s27 = scalar_lea.vmem %s655_s6, 512  ;;  %s558_s28 = smov [#allocation4]  }
  0x23   : > { %p476_p9 = scmp.ne.s32.totalorder %s655_s6, %s475_s27  ;;  %s480_s29 = sshll.u32 %s558_s28, 4  ;;  %s481_s29 = int_to_ptr.vmem [resolvable:$false] %s480_s29 }
  0x24   : > { %s482_s3 = scalar_lea.vmem %s481_s29, 1024  ;;  %p483_p11 = scmp.lt.s32.totalorder %s655_s6, %s481_s29 }
  0x25   : > { %p478_p12 = pnand %p476_p9, %p462_p13  ;;  %p484_p2 = scmp.lt.s32.totalorder %s482_s3, %s475_s27 }
  0x27   : > { %p479_p0 = pneg %p478_p12  ;;  %p485_p3 = por %p484_p2, %p483_p11 }
  0x29   : > { %p486_p4 = pnand %p485_p3, %p479_p0 }
  0x2b   : > { %489 = shalt.err (!%p486_p4)
}
  0x2c   : > { %s559_s4 = smov 256   ;;  %s560_s5 = smov 128  }
  0x2d   : > { %s561_s7 = smov 8   ;;  %p145_p13 = scmp.lt.s32.totalorder %s556_s18, 5 }
  0x2e   : > { %391 = dma.hbm_to_vmem [thread:$0]  (!%p661_p10), %s653_s9, 512, %s655_s6, %s666_s11, %s559_s4, %s560_s5, %s561_s7  }
  0x2f   : > { %p769_p1 = scmp.ge.s32.totalorder %s556_s18, 1 }
  0x31   : > { %p146_p5 = pnand %p769_p1, %p145_p13 }
  0x32   : > { %s151_s8 = sand.u32 (!%p146_p5), 1, %s532_s12  }
  0x33   : > { %149 = sbr.rel (%p146_p5) target bundleno = 242 (0xf2), region = 28  ;;  %s377_s0 = sshll.u32 (!%p146_p5), %s151_s8, 5 }
  0x34   : > { %s152_s21 = scalar_lea.sflag (!%p146_p5), [#allocation5], %s151_s8  ;;  %s155_s22 = scalar_lea.vmem (!%p146_p5), [#allocation4], %s377_s0 }
  0x3a   : > { %523 = dma.done.wait (%p637_p7), %s152_s21, 512  }
  0x3b   : > { %525 = vsyncadd (%p637_p7), %s152_s21, 4294966784  ;;  %v185_v0 = vld [vmem:[%s155_s22 + $0x10] sm:$0xff]  ;;  %v183_v1 = vld [vmem:[%s155_s22] sm:$0xff]  ;;  %s378_s6 = sshll.u32 %s544_s15, 2  ;;  %p380_p7 = scmp.ne.s32.totalorder %s540_s14, 0 }
  0x3c   : > { %191 = vmax.xlane.f32.xlu1 %v185_v0  ;;  %187 = vmax.xlane.f32.xlu0 %v183_v1  ;;  %v186_v2 = vld [vmem:[%s155_s22 + $0x18] sm:$0xff]  ;;  %v184_v3 = vld [vmem:[%s155_s22 + $0x8] sm:$0xff]  ;;  %p178_p10 = scmp.lt.s32.totalorder %s378_s6, 7  ;;  %vm207_vm0 = vcmask (!%p380_p7), 7168  }
  0x3e   : > { %s784_s6 = smov (!%p178_p10, %s378_s6), 7 }
  0x3f   : > { %s379_s9 = sshll.u32 %s784_s6, 3 }
  0x40   : > { %193 = vmax.xlane.f32.xlu1 %v186_v2  ;;  %189 = vmax.xlane.f32.xlu0 %v184_v3  ;;  %s706_s11 = scalar_lea.vmem %s765_s2, %s379_s9 }
  0x44   : > { %197 = vmin.xlane.f32.xlu1 %v184_v3  ;;  %195 = vmin.xlane.f32.xlu0 %v183_v1 }
  0x48   : > { %201 = vmin.xlane.f32.xlu1 %v186_v2  ;;  %199 = vmin.xlane.f32.xlu0 %v185_v0 }
  0xc9   : > { %v192_v4 = vpop.xlane.xlu1 %191  ;;  %v188_v5 = vpop.xlane.xlu0 %187 }
  0xca   : > { %208 = vst.msk [vmem:[%s706_s11] sm:$0xff] (!%p380_p7), %vm207_vm0, %v188_v5  ;;  %210 = vst.msk [vmem:[%s706_s11 + $0x10] sm:$0xff] (!%p380_p7), %vm207_vm0, %v192_v4 }
  0xcd   : > { %v194_v6 = vpop.xlane.xlu1 %193  ;;  %v190_v7 = vpop.xlane.xlu0 %189 }
  0xce   : > { %209 = vst.msk [vmem:[%s706_s11 + $0x8] sm:$0xff] (!%p380_p7), %vm207_vm0, %v190_v7  ;;  %211 = vst.msk [vmem:[%s706_s11 + $0x18] sm:$0xff] (!%p380_p7), %vm207_vm0, %v194_v6 }
  0xcf   : > { %206 = sbr.rel (%p380_p7) target bundleno = 215 (0xd7), region = 36 }
  0xd1   : > { %v198_v8 = vpop.xlane.xlu1 %197  ;;  %v196_v9 = vpop.xlane.xlu0 %195 }
  0xd2   : > { %212 = vst.msk [vmem:[#allocation2] sm:$0xff] (!%p380_p7), %vm207_vm0, %v196_v9  ;;  %213 = vst.msk [vmem:[#allocation2 + $0x8] sm:$0xff] (!%p380_p7), %vm207_vm0, %v198_v8 }
  0xd5   : > { %v202_v10 = vpop.xlane.xlu1 %201  ;;  %v200_v11 = vpop.xlane.xlu0 %199 }
  0xd6   : > { %214 = vst.msk [vmem:[#allocation2 + $0x10] sm:$0xff] %vm207_vm0, %v200_v11  ;;  %215 = vst.msk [vmem:[#allocation2 + $0x18] sm:$0xff] %vm207_vm0, %v202_v10 }
  0xd7 PF: > { %p381_p11 = scmp.le.s32.totalorder %s540_s14, 0 }
  0xd8   : > { %v220_v12 = vld [vmem:[%s706_s11] sm:$0xff] (!%p381_p11)  ;;  %v221_v13 = vld [vmem:[%s706_s11 + $0x8] sm:$0xff] (!%p381_p11)  ;;  %v222_v14 = vld [vmem:[%s706_s11 + $0x10] sm:$0xff] (!%p381_p11)  ;;  %vm228_vm1 = vcmask (!%p381_p11), 7168  }
  0xd9   : > { %219 = sbr.rel (%p381_p11) target bundleno = 225 (0xe1), region = 40  ;;  %v223_v15 = vld [vmem:[%s706_s11 + $0x18] sm:$0xff] (!%p381_p11)  ;;  %v224_v16 = vmax.f32 (!%p381_p11), %v220_v12, %v188_v5  ;;  %v225_v17 = vmax.f32 (!%p381_p11), %v221_v13, %v190_v7  ;;  %v226_v18 = vmax.f32 (!%p381_p11), %v222_v14, %v192_v4 }
  0xda   : > { %v233_v19 = vld [vmem:[#allocation2] sm:$0xff] (!%p381_p11)  ;;  %v234_v20 = vld [vmem:[#allocation2 + $0x8] sm:$0xff] (!%p381_p11)  ;;  %v227_v21 = vmax.f32 (!%p381_p11), %v223_v15, %v194_v6 }
  0xdb   : > { %v237_v22 = vmin.f32 (!%p381_p11), %v233_v19, %v196_v9  ;;  %v238_v23 = vmin.f32 (!%p381_p11), %v234_v20, %v198_v8  ;;  %229 = vst.msk [vmem:[%s706_s11] sm:$0xff] (!%p381_p11), %vm228_vm1, %v224_v16  ;;  %230 = vst.msk [vmem:[%s706_s11 + $0x8] sm:$0xff] (!%p381_p11), %vm228_vm1, %v225_v17 }
  0xdc   : > { %231 = vst.msk [vmem:[%s706_s11 + $0x10] sm:$0xff] (!%p381_p11), %vm228_vm1, %v226_v18  ;;  %232 = vst.msk [vmem:[%s706_s11 + $0x18] sm:$0xff] (!%p381_p11), %vm228_vm1, %v227_v21 }
  0xdd   : > { %v235_v24 = vld [vmem:[#allocation2 + $0x10] sm:$0xff] (!%p381_p11)  ;;  %v236_v25 = vld [vmem:[#allocation2 + $0x18] sm:$0xff] (!%p381_p11)  ;;  %241 = vst.msk [vmem:[#allocation2] sm:$0xff] (!%p381_p11), %vm228_vm1, %v237_v22  ;;  %242 = vst.msk [vmem:[#allocation2 + $0x8] sm:$0xff] (!%p381_p11), %vm228_vm1, %v238_v23 }
  0xde   : > { %v239_v26 = vmin.f32 (!%p381_p11), %v235_v24, %v200_v11  ;;  %v240_v27 = vmin.f32 (!%p381_p11), %v236_v25, %v202_v10 }
  0xe0   : > { %243 = vst.msk [vmem:[#allocation2 + $0x10] sm:$0xff] %vm228_vm1, %v239_v26  ;;  %244 = vst.msk [vmem:[#allocation2 + $0x18] sm:$0xff] %vm228_vm1, %v240_v27 }
  0xe1 PF: > { %p382_p6 = scmp.ne.s32.totalorder %s540_s14, 1 }
  0xe2   : > { %s249_s15 = sld [smem:[#allocation3]] (!%p382_p6)  ;;  %vm282_vm3 = vcmask (!%p382_p6), 7168  }
  0xe3   : > { %248 = sbr.rel (%p382_p6) target bundleno = 242 (0xf2), region = 44  ;;  %v250_v28 = vld [vmem:[%s706_s11] sm:$0xff] (!%p382_p6)  ;;  %v251_v29 = vld [vmem:[%s706_s11 + $0x8] sm:$0xff] (!%p382_p6) }
  0xe4   : > { %v252_v33 = vld [vmem:[%s706_s11 + $0x10] sm:$0xff] (!%p382_p6)  ;;  %v253_v34 = vld [vmem:[%s706_s11 + $0x18] sm:$0xff] (!%p382_p6)  ;;  %v254_v36 = vmax.f32 (!%p382_p6), %v250_v28, 1e-06  ;;  %v255_v37 = vmax.f32 (!%p382_p6), %v251_v29, 1e-06 }
  0xe5   : > { %v258_v30 = vld [vmem:[#allocation2] sm:$0xff] (!%p382_p6)  ;;  %v259_v31 = vld [vmem:[#allocation2 + $0x8] sm:$0xff] (!%p382_p6)  ;;  %v256_v41 = vmax.f32 (!%p382_p6), %v252_v33, 1e-06  ;;  %v257_v44 = vmax.f32 (!%p382_p6), %v253_v34, 1e-06 }
  0xe6   : > { %v262_v38 = vmax.f32 (!%p382_p6), %v258_v30, 1e-06  ;;  %v263_v39 = vmax.f32 (!%p382_p6), %v259_v31, 1e-06 }
  0xe7   : > { %v260_v32 = vld [vmem:[#allocation2 + $0x10] sm:$0xff] (!%p382_p6)  ;;  %v261_v35 = vld [vmem:[#allocation2 + $0x18] sm:$0xff] (!%p382_p6) }
  0xe8   : > { %p266_p8 = scmp.gt.f32.partialorder (!%p382_p6), %s249_s15, 0.0  ;;  %p267_p9 = scmp.lt.f32.partialorder (!%p382_p6), %s249_s15, 0.0  ;;  %v264_v40 = vmax.f32 (!%p382_p6), %v260_v32, 1e-06  ;;  %v265_v42 = vmax.f32 (!%p382_p6), %v261_v35, 1e-06 }
  0xea   : > { %s268_s14 = scalar_select %p267_p9, 1, 0 }
  0xeb   : > { %s275_s23 = scalar_select %p266_p8, 1, 0 }
  0xec   : > { %v269_v43 = vstv %s268_s14 }
  0xed   : > { %vm270_vm2 = vcmp.eq.s32.totalorder %v269_v43, 1  ;;  %v276_v45 = vstv %s275_s23 }
  0xee   : > { %v271_v46 = vsel %vm270_vm2, %v262_v38, 1.0  ;;  %vm277_vm4 = vcmp.eq.s32.totalorder %v276_v45, 1  ;;  %v272_v47 = vsel %vm270_vm2, %v263_v39, 1.0  ;;  %v273_v48 = vsel %vm270_vm2, %v264_v40, 1.0 }
  0xef   : > { %v278_v49 = vsel %vm277_vm4, %v254_v36, %v271_v46  ;;  %v279_v50 = vsel %vm277_vm4, %v255_v37, %v272_v47  ;;  %v280_v51 = vsel %vm277_vm4, %v256_v41, %v273_v48  ;;  %v274_v52 = vsel %vm270_vm2, %v265_v42, 1.0 }
  0xf0   : > { %283 = vst.msk [vmem:[%s706_s11] sm:$0xff] %vm282_vm3, %v278_v49  ;;  %v281_v53 = vsel %vm277_vm4, %v257_v44, %v274_v52  ;;  %284 = vst.msk [vmem:[%s706_s11 + $0x8] sm:$0xff] %vm282_vm3, %v279_v50 }
  0xf1   : > { %285 = vst.msk [vmem:[%s706_s11 + $0x10] sm:$0xff] %vm282_vm3, %v280_v51  ;;  %286 = vst.msk [vmem:[%s706_s11 + $0x18] sm:$0xff] %vm282_vm3, %v281_v53 }
  0xf2 PF: > { %s16_s18 = sadd.s32 1, %s556_s18   ;;  %s770_s11 = smov %s532_s12 }
  0xf3   : > { %p13_p12 = scmp.ge.s32.totalorder %s16_s18, 6   ;;  %s771_s12 = smov %s536_s13 }
  0xf4   : > { %s772_s13 = smov %s647_s30  ;;  %s773_s14 = smov %s548_s16 }
  0xf5   : > { %s774_s15 = smov %s552_s17  ;;  %s775_s16 = smov %s778_s19 }
  0xf6   : > { %s776_s17 = smov %s782_s20  ;;  %15 = sbr.rel (!%p13_p12) target bundleno = 7 (0x7), region = 80 }
  0xfd   :  { %309 = vsyncpa [#allocation5], 1 }
  0xfe   :  { %311 = vsyncpa [#allocation5 + $0x1], 1 }

</bundles_post_ra>
